<compile_context>
chip_gen: v7x
topology: tpu7x:2x2x1
jax: 0.10.0
libtpu: 0.0.40
codegen_flags: <defaults>
</compile_context>

<pallas_src>
import jax
import jax.numpy as jnp
from jax.experimental import pallas as pl
from jax.experimental.pallas import tpu as pltpu

_LANE = 128
_LANE_CANDIDATES = (1024, 512, 256, 128)
_MAX_BLOCK_BYTES = 16 * 1024 * 1024           # never bigger than 16 MiB per tile
_FALLBACK_VMEM_CAPACITY = 64 * 1024 * 1024    # conservative (safe even on v7x)


def _vmem_capacity_bytes() -> int:
    """Physical VMEM capacity, with a conservative fallback."""
    try:
        cap = int(pltpu.get_tpu_info().vmem_capacity_bytes)
        if cap > 0:
            return cap
    except Exception:
        pass
    return _FALLBACK_VMEM_CAPACITY


def _packed_sublanes(dtype) -> int:
    """Sublane packing count: 8 (4-byte), 16 (2-byte), 32 (1-byte) dtypes."""
    return max(8, 32 // max(1, jnp.dtype(dtype).itemsize))


def _hardsigmoid_kernel(x_ref, o_ref):
    x = x_ref[...]
    dt = x.dtype
    tmp = x + jnp.asarray(3.0, dt)
    ge0 = (tmp >= jnp.asarray(0.0, dt)).astype(dt)
    le6 = (tmp <= jnp.asarray(6.0, dt)).astype(dt)
    res = tmp * ge0 * le6                       # torch: mul(mul(tmp, ge0), le6)
    o_ref[...] = (res / jnp.asarray(6.0, dt)).astype(o_ref.dtype)
    # TODO(synk): FixedTensor(res/6).quant() omitted (definition not provided).


def hardsigmoid(x: jax.Array, *, max_block_bytes: int | None = None,
                donate: bool = False) -> jax.Array:
    """Elementwise 'zeroing' hardsigmoid; any input shape, same shape/dtype out."""
    orig_shape = x.shape
    dtype = x.dtype

    flat = x.reshape(-1)
    n = flat.shape[0]
    if n == 0:
        return x

    itemsize = jnp.dtype(dtype).itemsize
    sublanes = _packed_sublanes(dtype)

    cap = _vmem_capacity_bytes()
    if max_block_bytes is None:
        # ~capacity/8 per tile: 8 MiB on v7x, 16 MiB on v5e/v6e. Double-buffered
        # in+out that is 4x the tile size, well under the vmem limit below.
        max_block_bytes = min(cap // 8, _MAX_BLOCK_BYTES)
    vmem_limit = int(cap * 3 // 4)

    cost = pl.CostEstimate(flops=5 * n, transcendentals=0,
                           bytes_accessed=2 * n * itemsize)
    cparams = pltpu.CompilerParams(dimension_semantics=("parallel",),
                                   vmem_limit_bytes=vmem_limit)
    io_alias = {0: 0} if donate else {}

    if n % _LANE == 0:
        # ---- Lane-aligned path: 2-D lane-dense view, no pad, no tail slice ----
        lanes = next(c for c in _LANE_CANDIDATES if n % c == 0)
        rows = n // lanes
        x2d = flat.reshape(rows, lanes)

        block_rows = max(
            sublanes,
            (max_block_bytes // (lanes * itemsize)) // sublanes * sublanes)
        tr = min(block_rows, rows)   # tr == rows (full dim) is always legal;
                                     # otherwise it is a multiple of `sublanes`.
        grid = (pl.cdiv(rows, tr),)  # ragged final row-block is masked by Pallas

        out = pl.pallas_call(
            _hardsigmoid_kernel,
            out_shape=jax.ShapeDtypeStruct((rows, lanes), dtype),
            grid_spec=pltpu.PrefetchScalarGridSpec(
                num_scalar_prefetch=0,
                grid=grid,
                in_specs=[pl.BlockSpec((tr, lanes), lambda i: (i, 0))],
                out_specs=pl.BlockSpec((tr, lanes), lambda i: (i, 0)),
            ),
            compiler_params=cparams,
            cost_estimate=cost,
            input_output_aliases=io_alias,
        )(x2d)
    else:
        # ---- Unaligned path: flat 1-D array with a ragged final block --------
        # No wrapper-side pad / tail slice (saves ~2 full-array HBM passes).
        chunk = sublanes * _LANE
        block_elems = max(chunk, (max_block_bytes // itemsize) // chunk * chunk)
        if block_elems >= n:
            block_elems = n          # single block equal to the full dim: legal
        grid = (pl.cdiv(n, block_elems),)

        out = pl.pallas_call(
            _hardsigmoid_kernel,
            out_shape=jax.ShapeDtypeStruct((n,), dtype),
            grid_spec=pltpu.PrefetchScalarGridSpec(
                num_scalar_prefetch=0,
                grid=grid,
                in_specs=[pl.BlockSpec((block_elems,), lambda i: (i,))],
                out_specs=pl.BlockSpec((block_elems,), lambda i: (i,)),
            ),
            compiler_params=cparams,
            cost_estimate=cost,
            input_output_aliases=io_alias,
        )(flat)

    return out.reshape(orig_shape)


def _reference(x):
    dt = x.dtype
    tmp = x + jnp.asarray(3.0, dt)
    ge0 = (tmp >= jnp.asarray(0.0, dt)).astype(dt)
    le6 = (tmp <= jnp.asarray(6.0, dt)).astype(dt)
    return ((tmp * ge0 * le6) / jnp.asarray(6.0, dt)).astype(dt)


if __name__ == "__main__":
    key = jax.random.PRNGKey(0)
    k1, k2, k3, k4, k5 = jax.random.split(key, 5)

    # 1) NCHW activation map, element count divisible by 1024 -> wide-lane 2-D path.
    x1 = jax.random.normal(k1, (2, 4, 16, 16), dtype=jnp.float32) * 4.0
    y1 = hardsigmoid(x1)
    jax.block_until_ready(y1)
    assert y1.shape == x1.shape and y1.dtype == x1.dtype
    assert jnp.allclose(y1, _reference(x1), atol=1e-6), "mismatch (2-D aligned path)"

    # 2) Awkward shape (n % 128 != 0) -> pad-free 1-D path, single full block.
    x2 = jax.random.normal(k2, (3, 5, 37, 29), dtype=jnp.float32) * 4.0
    y2 = hardsigmoid(x2)
    jax.block_until_ready(y2)
    assert y2.shape == x2.shape and y2.dtype == x2.dtype
    assert jnp.allclose(y2, _reference(x2), atol=1e-6), "mismatch (1-D path)"

    # 3) 2-D path with a forced small tile -> multi-step grid, ragged final row block.
    x3 = jax.random.normal(k3, (2, 8, 37, 128), dtype=jnp.float32) * 4.0
    y3 = hardsigmoid(x3, max_block_bytes=16 * 1024 * 4)   # 16 rows of 1024 lanes
    jax.block_until_ready(y3)
    assert y3.shape == x3.shape and y3.dtype == x3.dtype
    assert jnp.allclose(y3, _reference(x3), atol=1e-6), "mismatch (2-D ragged grid)"

    # 4) 1-D path with a multi-step ragged grid + input/output aliasing.
    x4 = jax.random.normal(k4, (5, 1000), dtype=jnp.float32) * 4.0
    ref4 = _reference(x4)                       # compute ref before donating
    y4 = hardsigmoid(x4, max_block_bytes=2048 * 4, donate=True)
    jax.block_until_ready(y4)
    assert y4.shape == x4.shape and y4.dtype == x4.dtype
    assert jnp.allclose(y4, ref4, atol=1e-6), "mismatch (1-D ragged + alias)"

    # 5) bf16 input -> dtype-aware sublane packing (16), math stays in bf16.
    x5 = jax.random.normal(k5, (2, 4, 8, 32), dtype=jnp.bfloat16) * 4.0
    y5 = hardsigmoid(x5)
    jax.block_until_ready(y5)
    assert y5.shape == x5.shape and y5.dtype == x5.dtype
    assert jnp.allclose(y5.astype(jnp.float32),
                        _reference(x5).astype(jnp.float32), atol=2e-2), "mismatch (bf16)"

    print("KERNEL_OK")
</pallas_src>

<mosaic_0001>
module attributes {stable_mosaic.version = 11 : i64} {
  func.func @_hardsigmoid_kernel(%arg0: i32, %arg1: memref<2x1024xf32, #tpu.memory_space<vmem>>, %arg2: memref<2x1024xf32, #tpu.memory_space<vmem>>) attributes {dimension_semantics = [#tpu.dimension_semantics<parallel>], iteration_bounds = array<i64: 1>, scalar_prefetch = 0 : i64, scratch_operands = 0 : i64, tpu.core_type = #tpu.core_type<tc>, window_params = [{transform_indices = @transform_0, window_bounds = array<i64: 2, 1024>}, {transform_indices = @transform_1, window_bounds = array<i64: 2, 1024>}]} {
    %c0 = arith.constant 0 : index
    %c0_0 = arith.constant 0 : index
    %0 = vector.load %arg1[%c0, %c0_0] : memref<2x1024xf32, #tpu.memory_space<vmem>>, vector<2x1024xf32>
    %cst = arith.constant 3.000000e+00 : f32
    %1 = vector.broadcast %cst : f32 to vector<2x1024xf32>
    %2 = arith.addf %0, %1 : vector<2x1024xf32>
    %cst_1 = arith.constant 0.000000e+00 : f32
    %3 = vector.broadcast %cst_1 : f32 to vector<2x1024xf32>
    %4 = arith.cmpf oge, %2, %3 : vector<2x1024xf32>
    %5 = arith.extui %4 : vector<2x1024xi1> to vector<2x1024xi32>
    %6 = arith.sitofp %5 : vector<2x1024xi32> to vector<2x1024xf32>
    %cst_2 = arith.constant 6.000000e+00 : f32
    %7 = vector.broadcast %cst_2 : f32 to vector<2x1024xf32>
    %8 = arith.cmpf ole, %2, %7 : vector<2x1024xf32>
    %9 = arith.extui %8 : vector<2x1024xi1> to vector<2x1024xi32>
    %10 = arith.sitofp %9 : vector<2x1024xi32> to vector<2x1024xf32>
    %11 = arith.mulf %2, %6 : vector<2x1024xf32>
    %12 = arith.mulf %11, %10 : vector<2x1024xf32>
    %cst_3 = arith.constant 6.000000e+00 : f32
    %13 = vector.broadcast %cst_3 : f32 to vector<2x1024xf32>
    %14 = arith.divf %12, %13 : vector<2x1024xf32>
    %c0_4 = arith.constant 0 : index
    %c0_5 = arith.constant 0 : index
    %15 = vector.load %arg2[%c0_4, %c0_5] : memref<2x1024xf32, #tpu.memory_space<vmem>>, vector<2x1024xf32>
    tpu.vector_store %arg2[%c0_4, %c0_5], %14 {strides = array<i32>} : memref<2x1024xf32, #tpu.memory_space<vmem>>, vector<2x1024xf32>,
    return
  }
  func.func @transform_0(%arg0: i32) -> (i32, i32) {
    %c0_i32 = arith.constant 0 : i32
    %c0_i32_0 = arith.constant 0 : i32
    return %arg0, %c0_i32 : i32, i32
  }
  func.func @transform_1(%arg0: i32) -> (i32, i32) {
    %c0_i32 = arith.constant 0 : i32
    %c0_i32_0 = arith.constant 0 : i32
    return %arg0, %c0_i32 : i32, i32
  }
}

</mosaic_0001>

<bundles_post_ra>
// kernel: tpu_custom_call.1
= control target key start
LH: loop header
LB: loop body
LE: loop exit
PB: predicated region body
PF: predicated region fallthrough
CT: control target
= control target key end

     0   :  { %6 = vsyncpa [#allocation3], 0  ;;  %s153_s0 = inlined_call_operand.hbm [shape: f32[2,1024], index: 0, kind: input, shape index: {}]   ;;  %s154_s1 = inlined_call_operand.hbm [shape: f32[2,1024], index: 1, kind: output, shape index: {}]  }
   0x1   :  { %7 = vsyncpa [#allocation4], 0  ;;  %s116_s6 = smov [#allocation2]   ;;  %s68_s10 = scalar_lea.hbm %s153_s0, 256 }
   0x2   :  { %s14_s7 = sshll.u32 %s116_s6, 4  ;;  %p69_p0 = scmp.ne.s32.totalorder %s153_s0, %s68_s10  ;;  %s15_s7 = int_to_ptr.vmem [resolvable:$true] %s14_s7 }
   0x3   :  { %p72_p1 = scmp.lt.u32.totalorder %s68_s10, %s153_s0 }
   0x5   :  { %p74_p2 = pnand %p72_p1, %p69_p0 }
   0x7   :  { %77 = shalt.err (!%p74_p2)
}
   0x8   :  { %s78_s15 = scalar_lea.vmem %s15_s7, 256  ;;  %p83_p4 = scmp.lt.s32.totalorder %s15_s7, %s15_s7 }
   0x9   :  { %p79_p3 = scmp.ne.s32.totalorder %s15_s7, %s78_s15  ;;  %p84_p5 = scmp.lt.s32.totalorder %s78_s15, %s78_s15 }
   0xb   :  { %p85_p6 = por %p84_p5, %p83_p4 }
   0xd   :  { %p86_p7 = pnand %p85_p6, %p79_p3 }
   0xf   :  { %89 = shalt.err (!%p86_p7)
}
  0x10   :  { %17 = dma.hbm_to_vmem [thread:$0]  %s153_s0, 256, %s15_s7, [#allocation3]  }
  0x11   :  { %112 = dma.done.wait [#allocation3], 256  }
  0x12   :  { %113 = vsyncadd [#allocation3], 4294967040  ;;  %v21_v0 = vld [vmem:[#allocation2] sm:$0xff]  ;;  %v22_v1 = vld [vmem:[#allocation2 + $0x8] sm:$0xff]  ;;  %v117_v4 = vmov 0.0   ;;  %s118_s18 = smov [#allocation5]  }
  0x13   :  { %v23_v2 = vadd.f32 3.0, %v21_v0  ;;  %v24_v3 = vadd.f32 3.0, %v22_v1  ;;  %s52_s19 = sshll.u32 %s118_s18, 4  ;;  %s53_s19 = int_to_ptr.vmem [resolvable:$true] %s52_s19 }
  0x14   :  { %s90_s0 = scalar_lea.vmem %s53_s19, 256  ;;  %p95_p9 = scmp.lt.s32.totalorder %s53_s19, %s53_s19 }
  0x15   :  { %vm25_vm0 = vcmp.ge.f32.partialorder %v23_v2, 0.0  ;;  %vm31_vm1 = vcmp.le.f32.partialorder %v23_v2, 6.0  ;;  %vm26_vm2 = vcmp.ge.f32.partialorder %v24_v3, 0.0  ;;  %vm32_vm3 = vcmp.le.f32.partialorder %v24_v3, 6.0  ;;  %p91_p8 = scmp.ne.s32.totalorder %s53_s19, %s90_s0  ;;  %p96_p10 = scmp.lt.s32.totalorder %s90_s0, %s90_s0 }
  0x16   :  { %v61_v5 = vsel %vm25_vm0, 1.0, %v117_v4  ;;  %v63_v6 = vsel %vm31_vm1, 1.0, %v117_v4  ;;  %v62_v7 = vsel %vm26_vm2, 1.0, %v117_v4  ;;  %v64_v8 = vsel %vm32_vm3, 1.0, %v117_v4 }
  0x17   :  { %v37_v9 = vmul.f32 %v61_v5, %v23_v2  ;;  %v38_v10 = vmul.f32 %v62_v7, %v24_v3  ;;  %p97_p11 = por %p96_p10, %p95_p9 }
  0x19   :  { %v39_v11 = vmul.f32 %v63_v6, %v37_v9  ;;  %v40_v12 = vmul.f32 %v64_v8, %v38_v10  ;;  %p98_p12 = pnand %p97_p11, %p91_p8 }
  0x1b   :  { %v42_v13 = vmul.f32 0.16666667, %v39_v11  ;;  %v43_v14 = vmul.f32 0.16666667, %v40_v12 }
  0x1d   :  { %44 = vst [vmem:[#allocation5] sm:$0xff] %v42_v13  ;;  %45 = vst [vmem:[#allocation5 + $0x8] sm:$0xff] %v43_v14 }
  0x1e   :  { %101 = shalt.err (!%p98_p12)
}
  0x1f   :  { %s102_s22 = scalar_lea.hbm %s154_s1, 256 }
  0x20   :  { %p103_p13 = scmp.ne.s32.totalorder %s154_s1, %s102_s22  ;;  %p106_p0 = scmp.lt.u32.totalorder %s102_s22, %s154_s1 }
  0x22   :  { %p108_p1 = pnand %p106_p0, %p103_p13 }
  0x24   :  { %111 = shalt.err (!%p108_p1)
}
  0x25   :  { %55 = dma.vmem_to_hbm [thread:$0]  %s53_s19, 256, %s154_s1, [#allocation4]  }
  0x26   :  { %114 = dma.done.wait [#allocation4], 256  }
  0x27   :  { %115 = vsyncadd [#allocation4], 4294967040 }
  0x28   :  { %59 = vsyncpa [#allocation3], 1 }
  0x29   :  { %60 = vsyncpa [#allocation4], 1 }

</bundles_post_ra>
